<compile_context>
chip_gen: v7x
topology: tpu7x:2x2x1
jax: 0.10.0
libtpu: 0.0.40
codegen_flags: <defaults>
</compile_context>

<pallas_src>
import jax
import jax.numpy as jnp
from jax.experimental import pallas as pl
from jax.experimental.pallas import tpu as pltpu

_SUBLANE = 8
_LANE = 128


def _round_up(x, m):
    return ((x + m - 1) // m) * m


def _vmem_budget_bytes():
    """~75% of physical VMEM; conservative 64 MiB fallback (v7x-safe)."""
    try:
        cap = pltpu.get_tpu_info().vmem_capacity_bytes
    except Exception:
        cap = 64 * 1024 * 1024
    return int(cap * 3 // 4)


# --------------------------------------------------------------------------
# Kernels
# --------------------------------------------------------------------------
def _mlp_kernel(x_ref, w1_ref, b1_ref, w2_ref, b2_ref, o_ref):
    """Whole problem resident in VMEM (grid-free path)."""
    xc = x_ref[...].astype(w1_ref.dtype)                       # bf16 into MXU
    h = jnp.dot(xc, w1_ref[...], preferred_element_type=jnp.float32)
    h = jnp.maximum(h + b1_ref[...], 0.0)                      # bias (1,H) broadcasts
    y = jnp.dot(h.astype(w2_ref.dtype), w2_ref[...],
                preferred_element_type=jnp.float32)
    o_ref[...] = (y + b2_ref[...]).astype(o_ref.dtype)


def _mlp_acc_kernel(x_ref, w1_ref, b1_ref, w2_ref, b2_ref, o_ref, acc_ref):
    """Tiled path: grid = (batch tiles, hidden tiles); hidden axis is the
    reduction of the second matmul, accumulated in an f32 VMEM scratch."""
    k = pl.program_id(1)

    @pl.when(k == 0)
    def _init():
        acc_ref[...] = jnp.zeros_like(acc_ref)

    xc = x_ref[...].astype(w1_ref.dtype)                        # bf16 into MXU
    h = jnp.dot(xc, w1_ref[...], preferred_element_type=jnp.float32)
    h = jnp.maximum(h + b1_ref[...], 0.0)                       # ReLU on this H slice
    acc_ref[...] += jnp.dot(h.astype(w2_ref.dtype), w2_ref[...],
                            preferred_element_type=jnp.float32)

    @pl.when(k == pl.num_programs(1) - 1)
    def _finish():
        o_ref[...] = (acc_ref[...] + b2_ref[...]).astype(o_ref.dtype)


# --------------------------------------------------------------------------
# Tile planning
# --------------------------------------------------------------------------
def _plan_tiles(B, In, H, Out, w_bytes, budget):
    """Pick (block_b, block_h) against an explicit VMEM byte budget."""

    def weight_tile_bytes(bh, nbuf):
        # W1 tile + W2 tile + b1 tile in `nbuf` pipeline buffers, plus b2.
        return (In * bh + bh * Out + bh) * w_bytes * nbuf + Out * 4

    # Hidden (reduction) tile: keep the full weights resident when they fit in
    # half the budget single-buffered (their index_map is then constant).
    if weight_tile_bytes(H, 1) <= budget // 2:
        block_h = H
        w_cost = weight_tile_bytes(H, 1)
    else:
        block_h = _LANE
        while 2 * block_h < H and weight_tile_bytes(2 * block_h, 2) <= budget // 2:
            block_h *= 2
        w_cost = weight_tile_bytes(block_h, 2)

    # Batch tile: spend what is left on double-buffered x/out tiles + the f32
    # accumulator.  Prefer >=256 rows (2x256x256 MXU on v6e/v7x), cap at 4096.
    remaining = max(budget - w_cost, 0)
    per_row = In * 4 * 2 + Out * 4 * 2 + Out * 4
    block_b = 256
    while block_b * 2 <= 4096 and (block_b * 2) * per_row <= remaining:
        block_b *= 2
    while block_b > _SUBLANE and block_b * per_row > remaining:
        block_b //= 2
    return block_b, block_h


# --------------------------------------------------------------------------
# Forward pass
# --------------------------------------------------------------------------
def simple_nn_forward(x, w1, b1, w2, b2, *, compute_dtype=jnp.bfloat16,
                      block_b=None, block_h=None):
    """Fused forward pass of SimpleNN: relu(x @ W1 + b1) @ W2 + b2.

    x : (B, In) float32; w1: (In, H); b1: (1, H); w2: (H, Out); b2: (1, Out).
    Weights are fed to the MXU in `compute_dtype` (default bf16), accumulation
    and the returned output stay float32.
    """
    B, In = x.shape
    H = w1.shape[1]
    Out = w2.shape[1]
    b1 = jnp.asarray(b1).reshape(1, H).astype(jnp.float32)
    b2 = jnp.asarray(b2).reshape(1, Out).astype(jnp.float32)

    # Store / stream the weights in the MXU compute dtype (no-op if already).
    w1 = w1.astype(compute_dtype)
    w2 = w2.astype(compute_dtype)
    w_bytes = jnp.dtype(compute_dtype).itemsize
    out_dtype = jnp.float32

    budget = _vmem_budget_bytes()

    # ---- Tiny problems: single block, no grid, no pipeline overhead. ----
    resident_bytes = (B * In * 4 + B * Out * 4
                      + (In * H + H * Out) * w_bytes + (H + Out) * 4)
    if block_b is None and block_h is None and resident_bytes <= (1 << 20):
        # TODO(synk): on v7x this single-block path leaves one TensorCore idle;
        # acceptable only because the whole problem is ~1 MiB / microseconds.
        vmem = pl.BlockSpec(memory_space=pltpu.MemorySpace.VMEM)
        return pl.pallas_call(
            _mlp_kernel,
            out_shape=jax.ShapeDtypeStruct((B, Out), out_dtype),
            in_specs=[vmem] * 5,
            out_specs=vmem,
        )(x, w1, b1, w2, b2)

    # ---- Tiled path: grid over (batch tiles, hidden tiles). ----
    auto_b, auto_h = _plan_tiles(B, In, H, Out, w_bytes, budget)
    if block_b is None:
        block_b = auto_b
    if block_h is None:
        block_h = auto_h

    # Balanced batch tiles (multiple of 8 rows); pad B with zero rows.
    block_b = max(_SUBLANE, _round_up(block_b, _SUBLANE))
    n_b = -(-B // block_b)
    block_b = _round_up(-(-B // n_b), _SUBLANE)
    Bp = n_b * block_b
    if Bp != B:
        x = jnp.pad(x, ((0, Bp - B), (0, 0)))

    # Hidden-dim (reduction) tiling; zero-padded H columns/rows are inert
    # (relu(0 + 0) = 0 hidden units hitting zero W2 rows).
    if block_h >= H:
        block_h, n_h = H, 1
    else:
        block_h = _round_up(block_h, _LANE)
        n_h = -(-H // block_h)
        Hp = n_h * block_h
        if Hp != H:
            w1 = jnp.pad(w1, ((0, 0), (0, Hp - H)))
            b1 = jnp.pad(b1, ((0, 0), (0, Hp - H)))
            w2 = jnp.pad(w2, ((0, Hp - H), (0, 0)))

    def spec(shape, index_map, *, invariant=False):
        if invariant:
            # Grid-invariant operand: DMA'd once, keep a single VMEM buffer.
            return pl.BlockSpec(shape, index_map, pipeline_mode=pl.Buffered(1))
        return pl.BlockSpec(shape, index_map)

    w_invariant = (n_h == 1)   # weights fully resident across the grid
    out = pl.pallas_call(
        _mlp_acc_kernel,
        out_shape=jax.ShapeDtypeStruct((Bp, Out), out_dtype),
        grid=(n_b, n_h),
        in_specs=[
            spec((block_b, In), lambda i, k: (i, 0)),                       # x tile
            spec((In, block_h), lambda i, k: (0, k), invariant=w_invariant),  # W1
            spec((1, block_h), lambda i, k: (0, k), invariant=w_invariant),   # b1
            spec((block_h, Out), lambda i, k: (k, 0), invariant=w_invariant), # W2
            spec((1, Out), lambda i, k: (0, 0), invariant=True),              # b2
        ],
        out_specs=pl.BlockSpec((block_b, Out), lambda i, k: (i, 0)),
        scratch_shapes=[pltpu.VMEM((block_b, Out), jnp.float32)],
        compiler_params=pltpu.CompilerParams(
            dimension_semantics=("parallel", "arbitrary"),
            vmem_limit_bytes=budget,
        ),
    )(x, w1, b1, w2, b2)
    return out[:B] if Bp != B else out


# --------------------------------------------------------------------------
# Demo / self-test
# --------------------------------------------------------------------------
def _make_params(key, input_size, hidden_size, output_size,
                 weight_dtype=jnp.float32):
    k1, k2, k3, k4 = jax.random.split(key, 4)
    lim1 = 1.0 / (input_size ** 0.5)
    w1 = jax.random.uniform(k1, (input_size, hidden_size), minval=-lim1,
                            maxval=lim1, dtype=jnp.float32).astype(weight_dtype)
    b1 = jax.random.uniform(k2, (1, hidden_size), minval=-lim1, maxval=lim1,
                            dtype=jnp.float32)
    lim2 = 1.0 / (hidden_size ** 0.5)
    w2 = jax.random.uniform(k3, (hidden_size, output_size), minval=-lim2,
                            maxval=lim2, dtype=jnp.float32).astype(weight_dtype)
    b2 = jax.random.uniform(k4, (1, output_size), minval=-lim2, maxval=lim2,
                            dtype=jnp.float32)
    return w1, b1, w2, b2


def _reference(x, w1, b1, w2, b2):
    xf = x.astype(jnp.float32)
    h = jnp.maximum(xf @ w1.astype(jnp.float32) + b1.astype(jnp.float32), 0.0)
    return h @ w2.astype(jnp.float32) + b2.astype(jnp.float32)


if __name__ == "__main__":
    key = jax.random.PRNGKey(0)
    kx1, kp1, kx2, kp2, kx3, kp3 = jax.random.split(key, 6)

    # Case 1: tiny shapes like the original module example -> grid-free path.
    B1, In1, H1, O1 = 8, 16, 32, 8
    x1 = jax.random.normal(kx1, (B1, In1), dtype=jnp.float32)
    p1 = _make_params(kp1, In1, H1, O1)
    out1 = simple_nn_forward(x1, *p1)
    jax.block_until_ready(out1)
    assert out1.shape == (B1, O1)
    assert jnp.allclose(out1, _reference(x1, *p1), atol=1e-2, rtol=1e-2), \
        "grid-free path mismatch"

    # Case 2: batch- and hidden-tiled path (grid (2, 2)): bf16 weights streamed
    # in tiles, f32 accumulator, 256-row MXU-friendly batch tiles, two parallel
    # batch tiles for the two v7x TensorCores.
    B2, In2, H2, O2 = 512, 256, 512, 256
    x2 = jax.random.normal(kx2, (B2, In2), dtype=jnp.float32)
    p2 = _make_params(kp2, In2, H2, O2, weight_dtype=jnp.bfloat16)
    out2 = simple_nn_forward(x2, *p2, block_b=256, block_h=256)
    jax.block_until_ready(out2)
    assert out2.shape == (B2, O2)
    assert jnp.allclose(out2, _reference(x2, *p2), atol=3e-2, rtol=3e-2), \
        "tiled (batch x hidden) path mismatch"

    # Case 3: awkward batch size -> auto tile plan, zero-padded batch rows,
    # VMEM-resident weights single-buffered via pl.Buffered(1).
    B3, In3, H3, O3 = 300, 256, 512, 256
    x3 = jax.random.normal(kx3, (B3, In3), dtype=jnp.float32)
    p3 = _make_params(kp3, In3, H3, O3, weight_dtype=jnp.bfloat16)
    out3 = simple_nn_forward(x3, *p3)
    jax.block_until_ready(out3)
    assert out3.shape == (B3, O3)
    assert jnp.allclose(out3, _reference(x3, *p3), atol=3e-2, rtol=3e-2), \
        "padded-batch path mismatch"

    print("KERNEL_OK")
</pallas_src>

<mosaic_0001>
module attributes {stable_mosaic.version = 11 : i64} {
  func.func @_mlp_kernel(%arg0: memref<8x16xf32, #tpu.memory_space<vmem>>, %arg1: memref<16x32xbf16, #tpu.memory_space<vmem>>, %arg2: memref<1x32xf32, #tpu.memory_space<vmem>>, %arg3: memref<32x8xbf16, #tpu.memory_space<vmem>>, %arg4: memref<1x8xf32, #tpu.memory_space<vmem>>, %arg5: memref<8x8xf32, #tpu.memory_space<vmem>>) attributes {dimension_semantics = [], scalar_prefetch = 0 : i64, scratch_operands = 0 : i64, tpu.core_type = #tpu.core_type<tc>} {
    %c0 = arith.constant 0 : index
    %c0_0 = arith.constant 0 : index
    %0 = vector.load %arg0[%c0, %c0_0] : memref<8x16xf32, #tpu.memory_space<vmem>>, vector<8x16xf32>
    %1 = arith.truncf %0 : vector<8x16xf32> to vector<8x16xbf16>
    %c0_1 = arith.constant 0 : index
    %c0_2 = arith.constant 0 : index
    %2 = vector.load %arg1[%c0_1, %c0_2] : memref<16x32xbf16, #tpu.memory_space<vmem>>, vector<16x32xbf16>
    %cst = arith.constant dense<0.000000e+00> : vector<8x32xf32>
    %3 = tpu.matmul %1, %2, %cst {dimension_numbers = #tpu.dot_dimension_numbers<[1], [0], [0], [1], [0, 0, 1, 1], [], []>} : vector<8x16xbf16>, vector<16x32xbf16>, vector<8x32xf32> -> vector<8x32xf32>
    %c0_3 = arith.constant 0 : index
    %c0_4 = arith.constant 0 : index
    %4 = vector.load %arg2[%c0_3, %c0_4] : memref<1x32xf32, #tpu.memory_space<vmem>>, vector<1x32xf32>
    %5 = vector.broadcast %4 : vector<1x32xf32> to vector<8x32xf32>
    %6 = arith.addf %3, %5 : vector<8x32xf32>
    %cst_5 = arith.constant 0.000000e+00 : f32
    %7 = vector.broadcast %cst_5 : f32 to vector<8x32xf32>
    %8 = arith.maximumf %6, %7 : vector<8x32xf32>
    %9 = arith.truncf %8 : vector<8x32xf32> to vector<8x32xbf16>
    %c0_6 = arith.constant 0 : index
    %c0_7 = arith.constant 0 : index
    %10 = vector.load %arg3[%c0_6, %c0_7] : memref<32x8xbf16, #tpu.memory_space<vmem>>, vector<32x8xbf16>
    %cst_8 = arith.constant dense<0.000000e+00> : vector<8x8xf32>
    %11 = tpu.matmul %9, %10, %cst_8 {dimension_numbers = #tpu.dot_dimension_numbers<[1], [0], [0], [1], [0, 0, 1, 1], [], []>} : vector<8x32xbf16>, vector<32x8xbf16>, vector<8x8xf32> -> vector<8x8xf32>
    %c0_9 = arith.constant 0 : index
    %c0_10 = arith.constant 0 : index
    %12 = vector.load %arg4[%c0_9, %c0_10] : memref<1x8xf32, #tpu.memory_space<vmem>>, vector<1x8xf32>
    %13 = vector.broadcast %12 : vector<1x8xf32> to vector<8x8xf32>
    %14 = arith.addf %11, %13 : vector<8x8xf32>
    %c0_11 = arith.constant 0 : index
    %c0_12 = arith.constant 0 : index
    %15 = vector.load %arg5[%c0_11, %c0_12] : memref<8x8xf32, #tpu.memory_space<vmem>>, vector<8x8xf32>
    tpu.vector_store %arg5[%c0_11, %c0_12], %14 {strides = array<i32>} : memref<8x8xf32, #tpu.memory_space<vmem>>, vector<8x8xf32>,
    return
  }
}

</mosaic_0001>

<bundles_post_ra>
// kernel: tpu_custom_call.1
= control target key start
LH: loop header
LB: loop body
LE: loop exit
PB: predicated region body
PF: predicated region fallthrough
CT: control target
= control target key end

     0   :  { %v224_v1 = vmov 0.0   ;;  %vm39_vm0 = vcmask 130048   ;;  %vm225_vm1 = vmmov 0   ;;  %s287_s0 = inlined_call_operand.vmem [shape: f32[8,16], index: 0, kind: input, shape index: {}]   ;;  %s288_s1 = inlined_call_operand.vmem [shape: bf16[16,32], index: 1, kind: input, shape index: {}]   ;;  %s289_s2 = inlined_call_operand.vmem [shape: f32[1,32], index: 2, kind: input, shape index: {}]   ;;  %s290_s3 = inlined_call_operand.vmem [shape: bf16[32,8], index: 3, kind: input, shape index: {}]   ;;  %s291_s4 = inlined_call_operand.vmem [shape: f32[1,8], index: 4, kind: input, shape index: {}]   ;;  %s292_s5 = inlined_call_operand.hbm [shape: f32[8,8], index: 5, kind: output, shape index: {}]  }
   0x1   :  { %v197_v0 = vld [vmem:[%s288_s1] sm:$0xff]   ;;  %180 = vmatprep.subr.bf16.mxu0 %v224_v1  ;;  %186 = vmatprep.subr.bf16.mxu1 %v224_v1 }
   0x2   :  { %v22_v2 = vld [vmem:[%s287_s0] sm:$0xff]  ;;  %181 = vmatpush3.bf16.msra.mxu0 %v197_v0  ;;  %182 = vmatprep.mubr.msk.bf16.mxu0 %vm225_vm1, %v224_v1 }
   0x3   :  { %v23_v3 = vpack.c.bf16 %v22_v2, %v22_v2  ;;  %190 = vmatprep.mubr.msk.bf16.mxu1 %vm225_vm1, %v224_v1 }
   0x4   :  { %10 = vsyncpa [#allocation3], 0  ;;  %v198_v4 = vld [vmem:[%s290_s3] sm:$0xff]   ;;  %v199_v5 = vld [vmem:[%s290_s3 + $0x8] sm:$0xff]   ;;  %vm108_vm2 = vcmask 261120   ;;  %s226_s28 = smov [#allocation2]  }
   0x5   :  { %183 = vmatmul.mubr.msk.bf16.vlgmr.msra.gmra.mrb[0].mxu0 %vm39_vm0, %v23_v3  ;;  %187 = vmatpush3.bf16.msra.mxu1 %v198_v4  ;;  %v168_v6 = vld [vmem:[%s289_s2] ss:$0 sm:$0xff]  ;;  %s160_s3 = sshll.u32 %s226_s28, 4  ;;  %vm152_vm3 = vcmask 64512   ;;  %s161_s3 = int_to_ptr.vmem [resolvable:$true] %s160_s3 }
   0x6   :  { %188 = vmatprep.subr.bf16.mxu1 %v224_v1  ;;  %v171_v14 = vld [vmem:[%s291_s4] ss:$0 sm:$0xff]  ;;  %s200_s2 = scalar_lea.vmem %s161_s3, 128  ;;  %p205_p1 = scmp.lt.s32.totalorder %s161_s3, %s161_s3 }
   0x7   :  { %p201_p0 = scmp.ne.s32.totalorder %s161_s3, %s200_s2  ;;  %p206_p2 = scmp.lt.s32.totalorder %s200_s2, %s200_s2 }
   0x9   :  { %189 = vmatpush3.bf16.msra.mxu1 %v199_v5  ;;  %p207_p3 = por %p206_p2, %p205_p1 }
   0xb   :  { %p208_p4 = pnand %p207_p3, %p201_p0 }
  0xd8   :  { %v77_v7 = vpop.f32.mrb[0].mxu0 }
  0xd9   :  { %v78_v8 = vadd.f32 %v168_v6, %v77_v7  ;;  %v184_v9 = vpop.f32.mrb[1].mxu0 }
  0xda   :  { %v80_v10 = vpop.f32.mrb[2].mxu0 }
  0xdb   :  { %v83_v11 = vmax.f32 %v78_v8, 0.0  ;;  %v185_v12 = vpop.f32.mrb[3].mxu0 }
  0xdd   :  { %v84_v13 = vpack.c.bf16 %v83_v11, %v83_v11 }
  0xdf   :  { %191 = vmatmul.mubr.msk.bf16.vlgmr.msra.gmra.mrb[0].mxu1 %vm108_vm2, %v84_v13 }
 0x1b2   :  { %v146_v15 = vpop.f32.mrb[0].mxu1 }
 0x1b3   :  { %v147_v16 = vadd.f32 %v171_v14, %v146_v15  ;;  %v192_v17 = vpop.f32.mrb[1].mxu1 }
 0x1b4   :  { %v149_v18 = vpop.f32.mrb[2].mxu1 }
 0x1b5   :  { %v193_v19 = vpop.f32.mrb[3].mxu1  ;;  %153 = vst.msk [vmem:[#allocation2] sm:$0xff] %vm152_vm3, %v147_v16 }
 0x1b6   :  { %211 = shalt.err (!%p208_p4)
}
 0x1b7   :  { %s212_s4 = scalar_lea.hbm %s292_s5, 128 }
 0x1b8   :  { %p213_p5 = scmp.ne.s32.totalorder %s292_s5, %s212_s4  ;;  %p216_p6 = scmp.lt.u32.totalorder %s212_s4, %s292_s5 }
 0x1ba   :  { %p218_p7 = pnand %p216_p6, %p213_p5 }
 0x1bc   :  { %221 = shalt.err (!%p218_p7)
}
 0x1bd   :  { %163 = dma.vmem_to_hbm [thread:$0]  %s161_s3, 128, %s292_s5, [#allocation3]  }
 0x1be   :  { %222 = dma.done.wait [#allocation3], 128  }
 0x1bf   :  { %223 = vsyncadd [#allocation3], 4294967168 }
 0x1c0   :  { %167 = vsyncpa [#allocation3], 1 }

</bundles_post_ra>
